<compile_context>
chip_gen: v6e
topology: v6e:2x2x1
jax: 0.10.0
libtpu: 0.0.40
codegen_flags: <defaults>
</compile_context>

<pallas_src>
import functools

import jax
import jax.numpy as jnp
from jax import lax
from jax.experimental import pallas as pl
from jax.experimental.pallas import tpu as pltpu


def _round_up(x, m):
    return ((x + m - 1) // m) * m


def _focal_loss_kernel(pred_ref, target_ref, alpha_ref, out_ref, acc_ref, *,
                       gamma, n_true, tile_n):
    pid = pl.program_id(0)

    @pl.when(pid == 0)
    def _init():
        acc_ref[...] = jnp.zeros_like(acc_ref)

    logits = pred_ref[...].astype(jnp.float32)   # (tile_n, C)
    tgt = target_ref[...]                        # (tile_n, 1) int32
    alpha = alpha_ref[...]                       # (1, C) f32
    tn, c = logits.shape

    # Numerically-stable log-sum-exp for cross-entropy (reduction='none').
    m = jnp.max(logits, axis=-1, keepdims=True)                        # (tn, 1)
    lse = m + jnp.log(jnp.sum(jnp.exp(logits - m), axis=-1,
                              keepdims=True))                          # (tn, 1)

    # One-hot of the target class via iota compare (no dynamic gather on TPU).
    class_ids = lax.broadcasted_iota(jnp.int32, (tn, c), 1)            # (tn, C)
    onehot = class_ids == tgt                                          # (tn, C)

    # Target logit: XLU masked cross-lane reduce.
    picked = jnp.sum(jnp.where(onehot, logits, 0.0), axis=-1,
                     keepdims=True)                                    # (tn, 1)
    # alpha[target]: offload to the MXU (one-hot @ alpha^T), contracting C.
    alpha_t = lax.dot_general(onehot.astype(jnp.float32), alpha,
                              (((1,), (1,)), ((), ())),
                              preferred_element_type=jnp.float32)      # (tn, 1)

    ce = lse - picked                   # per-sample cross entropy
    pt = jnp.exp(-ce)                   # prob of the true class
    one_minus_pt = 1.0 - pt
    if float(gamma) == int(gamma):
        # Integer gamma (default 2.0): repeated multiply on the VPU.
        weight = lax.integer_pow(one_minus_pt, int(gamma))
    else:
        # Float gamma: clamp to avoid pow(negative, frac) -> NaN when pt ~ 1.
        weight = jnp.power(jnp.maximum(one_minus_pt, 0.0), gamma)

    focal = alpha_t * weight * ce                                      # (tn, 1)

    # Mask rows of the padded tail block so they contribute 0 to the sum.
    row = pid * tile_n + lax.broadcasted_iota(jnp.int32, (tn, 1), 0)
    focal = jnp.where(row < n_true, focal, 0.0)

    acc_ref[...] += jnp.sum(focal)

    @pl.when(pid == pl.num_programs(0) - 1)
    def _finalize():
        out_ref[...] = acc_ref[...] * jnp.float32(1.0 / n_true)


def enhanced_focal_loss(pred, target, alpha, gamma=2.0, tile_n=1024):
    """pred: (N, C) float logits, target: (N,) int labels, alpha: (C,) f32."""
    n, c = pred.shape

    # Tile size: at most `tile_n` rows, multiple of 8 (sublane), >= N if tiny.
    tn = min(_round_up(tile_n, 8), _round_up(n, 8))
    n_pad = pl.cdiv(n, tn) * tn
    if n_pad != n:
        pred = jnp.pad(pred, ((0, n_pad - n), (0, 0)))
        target = jnp.pad(target, (0, n_pad - n))

    target2d = target.astype(jnp.int32).reshape(n_pad, 1)
    alpha2d = alpha.astype(jnp.float32).reshape(1, c)
    grid = (n_pad // tn,)

    # Explicit VMEM budget: double-buffered pred + (lane-padded) target tiles,
    # with headroom; clamp so it is valid on v5e/v6e (128 MiB) and v7x (64 MiB).
    block_bytes = tn * max(c, 128) * 4 + tn * 128 * 4
    vmem_limit = int(min(64 << 20, max(32 << 20, 4 * block_bytes)))

    kernel = functools.partial(_focal_loss_kernel, gamma=gamma, n_true=n,
                               tile_n=tn)

    out = pl.pallas_call(
        kernel,
        out_shape=jax.ShapeDtypeStruct((1, 1), jnp.float32),
        grid_spec=pltpu.PrefetchScalarGridSpec(
            num_scalar_prefetch=0,
            grid=grid,
            in_specs=[
                pl.BlockSpec((tn, c), lambda i: (i, 0)),   # pred tile
                pl.BlockSpec((tn, 1), lambda i: (i, 0)),   # target tile
                pl.BlockSpec((1, c), lambda i: (0, 0)),    # alpha (resident)
            ],
            out_specs=pl.BlockSpec((1, 1), lambda i: (0, 0)),
            scratch_shapes=[pltpu.VMEM((1, 1), jnp.float32)],
        ),
        compiler_params=pltpu.CompilerParams(
            dimension_semantics=("arbitrary",),   # reduction axis (resident acc)
            vmem_limit_bytes=vmem_limit,
        ),
    )(pred, target2d, alpha2d)
    return out[0, 0]


def _reference(pred, target, alpha, gamma=2.0):
    logp = jax.nn.log_softmax(pred.astype(jnp.float32), axis=-1)
    ce = -jnp.take_along_axis(logp, target[:, None], axis=-1)[:, 0]
    pt = jnp.exp(-ce)
    alpha_t = alpha[target]
    return jnp.mean(alpha_t * (1.0 - pt) ** gamma * ce)


if __name__ == "__main__":
    num_classes = 5
    batch = 8
    gamma = 2.0

    key = jax.random.PRNGKey(0)
    k_pred, k_tgt, k_pred2, k_tgt2 = jax.random.split(key, 4)

    # Primary case matching the module defaults: (8, 5) logits, alpha=ones.
    pred = jax.random.normal(k_pred, (batch, num_classes), dtype=jnp.float32)
    target = jax.random.randint(k_tgt, (batch,), 0, num_classes, dtype=jnp.int32)
    alpha = jnp.ones((num_classes,), dtype=jnp.float32)  # __init__ alpha=None

    loss = enhanced_focal_loss(pred, target, alpha, gamma=gamma)
    loss = jax.block_until_ready(loss)
    ref = _reference(pred, target, alpha, gamma=gamma)
    assert jnp.allclose(loss, ref, atol=1e-5, rtol=1e-5), (loss, ref)

    # Multi-tile case: exercises grid accumulation + padded-tail masking.
    n2 = 300
    pred2 = jax.random.normal(k_pred2, (n2, num_classes), dtype=jnp.float32)
    target2 = jax.random.randint(k_tgt2, (n2,), 0, num_classes, dtype=jnp.int32)
    alpha2 = jnp.linspace(0.25, 1.0, num_classes, dtype=jnp.float32)

    loss2 = enhanced_focal_loss(pred2, target2, alpha2, gamma=gamma, tile_n=128)
    loss2 = jax.block_until_ready(loss2)
    ref2 = _reference(pred2, target2, alpha2, gamma=gamma)
    assert jnp.allclose(loss2, ref2, atol=1e-5, rtol=1e-5), (loss2, ref2)

    print("KERNEL_OK")
</pallas_src>

<mosaic_0001>
module attributes {stable_mosaic.version = 11 : i64} {
  func.func @_focal_loss_kernel(%arg0: i32, %arg1: memref<8x5xf32, #tpu.memory_space<vmem>>, %arg2: memref<8x1xi32, #tpu.memory_space<vmem>>, %arg3: memref<1x5xf32, #tpu.memory_space<vmem>>, %arg4: memref<1x1xf32, #tpu.memory_space<vmem>>, %arg5: memref<1x1xf32, #tpu.memory_space<vmem>>) attributes {dimension_semantics = [#tpu.dimension_semantics<arbitrary>], iteration_bounds = array<i64: 1>, scalar_prefetch = 0 : i64, scratch_operands = 1 : i64, tpu.core_type = #tpu.core_type<tc>, window_params = [{transform_indices = @transform_0, window_bounds = array<i64: 8, 5>}, {transform_indices = @transform_1, window_bounds = array<i64: 8, 1>}, {pipeline_mode = #tpu.pipeline_mode<synchronous>, transform_indices = @transform_2, window_bounds = array<i64: 1, 5>}, {pipeline_mode = #tpu.pipeline_mode<synchronous>, transform_indices = @transform_3, window_bounds = array<i64: 1, 1>}]} {
    %c0_i32 = arith.constant 0 : i32
    %0 = arith.cmpi eq, %arg0, %c0_i32 : i32
    %1 = arith.extui %0 : i1 to i32
    %c0_i32_0 = arith.constant 0 : i32
    %2 = arith.cmpi ne, %1, %c0_i32_0 : i32
    scf.if %2 {
      %cst_21 = arith.constant 0.000000e+00 : f32
      %53 = vector.broadcast %cst_21 : f32 to vector<1x1xf32>
      %c0_22 = arith.constant 0 : index
      %c0_23 = arith.constant 0 : index
      %54 = vector.load %arg5[%c0_22, %c0_23] : memref<1x1xf32, #tpu.memory_space<vmem>>, vector<1x1xf32>
      tpu.vector_store %arg5[%c0_22, %c0_23], %53 {strides = array<i32>} : memref<1x1xf32, #tpu.memory_space<vmem>>, vector<1x1xf32>,
    } else {
    }
    %c0 = arith.constant 0 : index
    %c0_1 = arith.constant 0 : index
    %3 = vector.load %arg1[%c0, %c0_1] : memref<8x5xf32, #tpu.memory_space<vmem>>, vector<8x5xf32>
    %c0_2 = arith.constant 0 : index
    %c0_3 = arith.constant 0 : index
    %4 = vector.load %arg2[%c0_2, %c0_3] : memref<8x1xi32, #tpu.memory_space<vmem>>, vector<8x1xi32>
    %c0_4 = arith.constant 0 : index
    %c0_5 = arith.constant 0 : index
    %5 = vector.load %arg3[%c0_4, %c0_5] : memref<1x5xf32, #tpu.memory_space<vmem>>, vector<1x5xf32>
    %cst = arith.constant dense<0xFF800000> : vector<8xf32>
    %6 = vector.multi_reduction <maximumf>, %3, %cst [1] : vector<8x5xf32> to vector<8xf32>
    %7 = vector.shape_cast %6 : vector<8xf32> to vector<8x1xf32>
    %8 = vector.broadcast %7 : vector<8x1xf32> to vector<8x5xf32>
    %9 = arith.subf %3, %8 : vector<8x5xf32>
    %10 = math.exp %9 : vector<8x5xf32>
    %cst_6 = arith.constant dense<0.000000e+00> : vector<8xf32>
    %11 = vector.multi_reduction <add>, %10, %cst_6 [1] : vector<8x5xf32> to vector<8xf32>
    %12 = vector.shape_cast %11 : vector<8xf32> to vector<8x1xf32>
    %13 = math.log %12 : vector<8x1xf32>
    %14 = arith.addf %7, %13 : vector<8x1xf32>
    %15 = tpu.iota {dimensions = array<i32: 1>} : vector<8x5xi32>
    %16 = vector.broadcast %4 : vector<8x1xi32> to vector<8x5xi32>
    %17 = arith.cmpi eq, %15, %16 : vector<8x5xi32>
    %cst_7 = arith.constant 0.000000e+00 : f32
    %18 = vector.broadcast %cst_7 : f32 to vector<8x5xf32>
    %19 = arith.select %17, %3, %18 : vector<8x5xi1>, vector<8x5xf32>
    %cst_8 = arith.constant dense<0.000000e+00> : vector<8xf32>
    %20 = vector.multi_reduction <add>, %19, %cst_8 [1] : vector<8x5xf32> to vector<8xf32>
    %21 = vector.shape_cast %20 : vector<8xf32> to vector<8x1xf32>
    %22 = arith.extui %17 : vector<8x5xi1> to vector<8x5xi32>
    %23 = arith.sitofp %22 : vector<8x5xi32> to vector<8x5xf32>
    %cst_9 = arith.constant dense<0.000000e+00> : vector<8x1xf32>
    %24 = tpu.matmul %23, %5, %cst_9 {dimension_numbers = #tpu.dot_dimension_numbers<[1], [1], [0], [0], [0, 0, 1, 0], [], []>} : vector<8x5xf32>, vector<1x5xf32>, vector<8x1xf32> -> vector<8x1xf32>
    %25 = arith.subf %14, %21 : vector<8x1xf32>
    %cst_10 = arith.constant 0.000000e+00 : f32
    %26 = vector.broadcast %cst_10 : f32 to vector<8x1xf32>
    %27 = arith.subf %26, %25 : vector<8x1xf32>
    %28 = math.exp %27 : vector<8x1xf32>
    %cst_11 = arith.constant 1.000000e+00 : f32
    %29 = vector.broadcast %cst_11 : f32 to vector<8x1xf32>
    %30 = arith.subf %29, %28 : vector<8x1xf32>
    %31 = arith.mulf %30, %30 : vector<8x1xf32>
    %32 = arith.mulf %24, %31 : vector<8x1xf32>
    %33 = arith.mulf %32, %25 : vector<8x1xf32>
    %c8_i32 = arith.constant 8 : i32
    %34 = arith.muli %arg0, %c8_i32 : i32
    %35 = tpu.iota {dimensions = array<i32: 0>} : vector<8x1xi32>
    %36 = vector.broadcast %34 : i32 to vector<8x1xi32>
    %37 = arith.addi %36, %35 : vector<8x1xi32>
    %c8_i32_12 = arith.constant 8 : i32
    %38 = vector.broadcast %c8_i32_12 : i32 to vector<8x1xi32>
    %39 = arith.cmpi slt, %37, %38 : vector<8x1xi32>
    %cst_13 = arith.constant 0.000000e+00 : f32
    %40 = vector.broadcast %cst_13 : f32 to vector<8x1xf32>
    %41 = arith.select %39, %33, %40 : vector<8x1xi1>, vector<8x1xf32>
    %c0_14 = arith.constant 0 : index
    %c0_15 = arith.constant 0 : index
    %42 = vector.load %arg5[%c0_14, %c0_15] : memref<1x1xf32, #tpu.memory_space<vmem>>, vector<1x1xf32>
    %43 = vector.shape_cast %41 : vector<8x1xf32> to vector<1x8x1xf32>
    %cst_16 = arith.constant dense<0.000000e+00> : vector<1xf32>
    %44 = vector.multi_reduction <add>, %43, %cst_16 [1, 2] : vector<1x8x1xf32> to vector<1xf32>
    %45 = vector.shape_cast %44 : vector<1xf32> to vector<1x1x1xf32>
    %46 = vector.extract %45[0, 0, 0] : f32 from vector<1x1x1xf32>
    %47 = vector.broadcast %46 : f32 to vector<1x1xf32>
    %48 = arith.addf %42, %47 : vector<1x1xf32>
    %c0_17 = arith.constant 0 : index
    %c0_18 = arith.constant 0 : index
    %49 = vector.load %arg5[%c0_17, %c0_18] : memref<1x1xf32, #tpu.memory_space<vmem>>, vector<1x1xf32>
    tpu.vector_store %arg5[%c0_17, %c0_18], %48 {strides = array<i32>} : memref<1x1xf32, #tpu.memory_space<vmem>>, vector<1x1xf32>,
    %c0_i32_19 = arith.constant 0 : i32
    %50 = arith.cmpi eq, %arg0, %c0_i32_19 : i32
    %51 = arith.extui %50 : i1 to i32
    %c0_i32_20 = arith.constant 0 : i32
    %52 = arith.cmpi ne, %51, %c0_i32_20 : i32
    scf.if %52 {
      %c0_21 = arith.constant 0 : index
      %c0_22 = arith.constant 0 : index
      %53 = vector.load %arg5[%c0_21, %c0_22] : memref<1x1xf32, #tpu.memory_space<vmem>>, vector<1x1xf32>
      %cst_23 = arith.constant 1.250000e-01 : f32
      %54 = vector.broadcast %cst_23 : f32 to vector<1x1xf32>
      %55 = arith.mulf %53, %54 : vector<1x1xf32>
      %c0_24 = arith.constant 0 : index
      %c0_25 = arith.constant 0 : index
      %56 = vector.load %arg4[%c0_24, %c0_25] : memref<1x1xf32, #tpu.memory_space<vmem>>, vector<1x1xf32>
      tpu.vector_store %arg4[%c0_24, %c0_25], %55 {strides = array<i32>} : memref<1x1xf32, #tpu.memory_space<vmem>>, vector<1x1xf32>,
    } else {
    }
    return
  }
  func.func @transform_0(%arg0: i32) -> (i32, i32) {
    %c0_i32 = arith.constant 0 : i32
    %c0_i32_0 = arith.constant 0 : i32
    return %arg0, %c0_i32 : i32, i32
  }
  func.func @transform_1(%arg0: i32) -> (i32, i32) {
    %c0_i32 = arith.constant 0 : i32
    %c0_i32_0 = arith.constant 0 : i32
    return %arg0, %c0_i32 : i32, i32
  }
  func.func @transform_2(%arg0: i32) -> (i32, i32) {
    %c0_i32 = arith.constant 0 : i32
    %c0_i32_0 = arith.constant 0 : i32
    %c0_i32_1 = arith.constant 0 : i32
    return %c0_i32, %c0_i32_0 : i32, i32
  }
  func.func @transform_3(%arg0: i32) -> (i32, i32) {
    %c0_i32 = arith.constant 0 : i32
    %c0_i32_0 = arith.constant 0 : i32
    %c0_i32_1 = arith.constant 0 : i32
    return %c0_i32, %c0_i32_0 : i32, i32
  }
}

</mosaic_0001>

<bundles_post_ra>
// kernel: tpu_custom_call.1
= control target key start
LH: loop header
LB: loop body
LE: loop exit
PB: predicated region body
PF: predicated region fallthrough
CT: control target
= control target key end

     0   :  { %vm24_vm0 = vcmask 39936   ;;  %s188_s0 = inlined_call_operand.vmem [shape: f32[8,5], index: 0, kind: input, shape index: {}]   ;;  %s189_s1 = inlined_call_operand.vmem [shape: s32[8,1], index: 1, kind: input, shape index: {}]   ;;  %s190_s2 = inlined_call_operand.vmem [shape: f32[1,5], index: 2, kind: input, shape index: {}]   ;;  %s191_s3 = inlined_call_operand.hbm [shape: f32[1,1], index: 3, kind: output, shape index: {}]  }
   0x1   :  { %v21_v0 = vld [vmem:[%s188_s0] sm:$0xff] }
   0x2   :  { %8 = vsyncpa [#allocation4], 0  ;;  %v25_v1 = vsel %vm24_vm0, %v21_v0, -inf  ;;  %v146_v2 = vmov 0   ;;  %v22_v3 = vld [vmem:[%s189_s1] sm:$0xff]  ;;  %vm19_vm1 = vcmask 0   ;;  %v37_v8 = vlaneseq }
   0x3   :  { %117 = vset.pattern.permute.xlu0 %v146_v2  ;;  %v147_v4 = vmov 0.0   ;;  %v111_v14 = vld [vmem:[%s190_s2] ss:$0 sm:$0xff]  ;;  %vm75_vm3 = vcmask 7168   ;;  %s148_s2 = smov [#allocation3]  }
   0x4   :  { %26 = vmax.xlane.f32.xlu0 %v25_v1  ;;  %20 = vst.msk [vmem:[#allocation2] sm:$0x1] %vm19_vm1, %v147_v4  ;;  %v38_v9 = vand.u32 127, %v37_v8  ;;  %s102_s17 = sshll.u32 %s148_s2, 4  ;;  %s103_s17 = int_to_ptr.vmem [resolvable:$true] %s102_s17 }
   0x5   :  { %s124_s18 = scalar_lea.vmem %s103_s17, 16  ;;  %s128_s19 = scalar_lea.vmem %s103_s17, 32 }
   0x6   :  { %p125_p0 = scmp.ne.s32.totalorder %s103_s17, %s124_s18  ;;  %p129_p1 = scmp.lt.s32.totalorder %s103_s17, %s103_s17 }
   0x7   :  { %p130_p2 = scmp.lt.s32.totalorder %s128_s19, %s124_s18 }
   0x9   :  { %p131_p3 = por %p130_p2, %p129_p1 }
   0xb   :  { %v74_v41 = vld [vmem:[#allocation2] sm:$0x1]  ;;  %p132_p4 = pnand %p131_p3, %p125_p0 }
  0x1a   :  { %40 = vperm.xlu0 %117, %v22_v3  }
  0x8d   :  { %v27_v5 = vpop.xlane.xlu0 %26 }
  0x8e   :  { %v28_v6 = vsub.f32 %v21_v0, %v27_v5 }
  0x90   :  { %v29_v7 = vmul.f32 1.442695, %v28_v6 }
  0x92   :  { %118 = vpow2.f32 %v29_v7 }
  0x95   :  { %v41_v10 = vpop.permute.xlu0 %40 }
  0x96   :  { %vm42_vm2 = vcmp.eq.s32.totalorder %v38_v9, %v41_v10 }
  0x97   :  { %v110_v12 = vsel %vm42_vm2, 1.0, %v147_v4  ;;  %v43_v13 = vsel %vm42_vm2, %v21_v0, 0.0 }
  0x98   :  { %v44_v16 = vsel %vm24_vm0, %v43_v13, 0.0  ;;  %v55_v17 = vmul.f32 %v111_v14, %v110_v12 }
  0x9a   :  { %v56_v18 = vsel %vm24_vm0, %v55_v17, 0.0 }
  0x9f   :  { %v119_v11 = vpop.eup %118 }
  0xa0   :  { %v31_v15 = vsel %vm24_vm0, %v119_v11, 0.0 }
  0xa1   :  { %32 = vadd.xlane.f32.xlu1 %v31_v15 }
  0xa5   :  { %45 = vadd.xlane.f32.xlu1 %v44_v16 }
  0xa9   :  { %57 = vadd.xlane.f32.xlu1 %v56_v18 }
 0x12a   :  { %v33_v19 = vpop.xlane.xlu1 %32 }
 0x12b   :  { %120 = vlog2.f32 %v33_v19 }
 0x12e   :  { %v46_v23 = vpop.xlane.xlu1 %45 }
 0x132   :  { %v58_v30 = vpop.xlane.xlu1 %57 }
 0x138   :  { %v121_v20 = vpop.eup %120 }
 0x139   :  { %v35_v21 = vmul.f32 0.6931472, %v121_v20 }
 0x13b   :  { %v36_v22 = vadd.f32 %v35_v21, %v27_v5 }
 0x13d   :  { %v59_v24 = vsub.f32 %v36_v22, %v46_v23 }
 0x13f   :  { %v60_v25 = vsub.f32 0.0, %v59_v24 }
 0x141   :  { %v61_v26 = vmul.f32 1.442695, %v60_v25 }
 0x143   :  { %122 = vpow2.f32 %v61_v26 }
 0x150   :  { %v123_v27 = vpop.eup %122 }
 0x151   :  { %v63_v28 = vsub.f32 1.0, %v123_v27 }
 0x153   :  { %v64_v29 = vmul.f32 %v63_v28, %v63_v28 }
 0x155   :  { %v65_v31 = vmul.f32 %v64_v29, %v58_v30 }
 0x157   :  { %v66_v32 = vmul.f32 %v65_v31, %v59_v24 }
 0x159   :  { %v76_v33 = vsel %vm75_vm3, %v66_v32, 0.0 }
 0x15a   :  { %77 = vadd.xlane.f32.xlu1 %v76_v33 }
 0x1e3   :  { %v78_v34 = vpop.xlane.xlu1 %77 }
 0x1e4   :  { %v79_v35 = vrot.slane %v78_v34, 4 }
 0x1e6   :  { %v80_v36 = vadd.f32 %v79_v35, %v78_v34 }
 0x1e8   :  { %v81_v37 = vrot.slane %v80_v36, 2 }
 0x1ea   :  { %v82_v38 = vadd.f32 %v81_v37, %v80_v36 }
 0x1ec   :  { %v83_v39 = vrot.slane %v82_v38, 1 }
 0x1ee   :  { %v84_v40 = vadd.f32 %v83_v39, %v82_v38 }
 0x1f0   :  { %112 = vpush %v84_v40 }
 0x221   :  { %s113_s1 = spop %112 }
 0x222   :  { %v86_v42 = vstv %s113_s1 }
 0x223   :  { %v87_v43 = vadd.f32 %v86_v42, %v74_v41 }
 0x225   :  { %89 = vst.msk [vmem:[#allocation2] sm:$0x1] %vm19_vm1, %v87_v43 }
 0x22c   :  { %v93_v44 = vld [vmem:[#allocation2] sm:$0x1] }
 0x22d   :  { %v94_v45 = vmul.f32 0.125, %v93_v44 }
 0x22f   :  { %95 = vst.msk [vmem:[#allocation3] sm:$0x1] %vm19_vm1, %v94_v45 }
 0x230   :  { %135 = shalt.err (!%p132_p4)
}
 0x231   :  { %105 = dma.vmem_to_hbm [thread:$0]  %s103_s17, 16, %s191_s3, [#allocation4]  }
 0x232   :  { %144 = dma.done.wait [#allocation4], 16  }
 0x233   :  { %145 = vsyncadd [#allocation4], 4294967280 }
 0x234   :  { %109 = vsyncpa [#allocation4], 1 }

</bundles_post_ra>
